<compile_context>
chip_gen: v7x
topology: tpu7x:2x2x1
jax: 0.10.0
libtpu: 0.0.40
codegen_flags: <defaults>
</compile_context>

<pallas_src>
import functools

import numpy as np
import jax
import jax.numpy as jnp
from jax.experimental import pallas as pl
from jax.experimental.pallas import tpu as pltpu


# ----------------------------------------------------------------------------
# Fused kernel: rank-select order statistics -> fc1 (folded, one dot) -> ReLU -> fc2
# ----------------------------------------------------------------------------
def _fused_kernel(x_ref, w_ref, b1_ref, w2_ref, b2_ref, o_ref, *, n, unique_ranks):
    # x_ref : (B_blk, n, d)   input tile features (native layout, feature dim lane-dense)
    # w_ref : (R*d, H)        fc1 weights, interpolation + d-major cat order pre-folded
    # b1_ref: (1, H)  w2_ref: (1, H)  b2_ref: (1, 1)
    # o_ref : (1, B_blk)      lane-dense output row (batch on lanes)
    v = x_ref[...].astype(jnp.float32)                       # upcast once (bf16-safe)
    B, _, d = v.shape

    # Stable rank of each element along the tile axis (axis=1):
    #   rank[j] = #{i : v[i] < v[j]} + #{i < j : v[i] == v[j]}
    # Ranks form a permutation of 0..n-1, so rank-select reproduces torch.sort values.
    # Tie mask only depends on the tile index -> small (1, n, d) iota, not (B, n, d).
    col = jax.lax.broadcasted_iota(jnp.int32, (1, n, d), 1)
    rank = jnp.zeros((B, n, d), jnp.int32)
    if n <= 64:
        # small n: full static unroll is cheapest
        for i in range(n):
            vi = v[:, i : i + 1, :]                           # [B, 1, d] sublane bcast
            ind = (vi < v) | ((vi == v) & (col > i))          # fused disjoint predicates
            rank = rank + ind.astype(jnp.int32)
    else:
        # large n: bounded-unroll loop avoids vreg spills / compile blowup
        def rank_update(i, r):
            vi = jax.lax.dynamic_slice_in_dim(v, i, 1, axis=1)
            ind = (vi < v) | ((vi == v) & (col > i))
            return r + ind.astype(jnp.int32)

        rank = jax.lax.fori_loop(0, n, rank_update, rank, unroll=8)

    # One masked reduction per unique order-statistic rank; concatenate into a single
    # [B, R*d] feature block and contract against the pre-folded fc1 in ONE MXU push.
    sel = [jnp.sum(jnp.where(rank == r, v, 0.0), axis=1) for r in unique_ranks]  # R x [B, d]
    feats = jnp.concatenate(sel, axis=-1)                                        # [B, R*d]

    h = jnp.dot(feats.astype(w_ref.dtype), w_ref[...],
                preferred_element_type=jnp.float32)           # [B, H], f32 accumulation
    h = jnp.maximum(h + b1_ref[...], 0.0)                     # ReLU (Dropout p=0 == identity)

    # fc2 ([H, 1]) as a VPU reduction; emit lane-dense (1, B) row.
    out = jnp.sum(h * w2_ref[...], axis=-1)[None, :] + b2_ref[...]   # (1, B)
    o_ref[...] = out.astype(o_ref.dtype)


# ----------------------------------------------------------------------------
# Batch block sizing against VMEM
# ----------------------------------------------------------------------------
def _pick_batch_block(b, n, d, R, H, x_itemsize, budget_bytes):
    """Largest rows-per-step that fits the VMEM sizing budget (capped at 256 where
    step-overhead amortization saturates), multiple of 8, split into >=2 balanced
    steps when possible so v7x's second TensorCore gets work on the parallel axis."""
    # live set per row: double-buffered input block + v (f32) + rank (i32) + one live
    # compare mask + fused feature row + hidden activations
    per_row = 2 * n * d * x_itemsize + 3 * n * d * 4 + (R * d + H) * 4
    weights = 2 * (R * d * H + 2 * H + 1) * 4          # (double-buffered) resident weights
    avail = max(budget_bytes - weights, 8 * per_row)
    cap = min(256, max(8, avail // per_row))
    cap = int(cap) // 8 * 8
    if b <= 8:
        return b
    if b <= cap:
        if b < 16:
            return b
        half = (b + 1) // 2
        return min(cap, ((half + 7) // 8) * 8)
    return cap


# ----------------------------------------------------------------------------
# Wrapper
# ----------------------------------------------------------------------------
def percentile_model_forward(
    x, w1, b1, w2, b2, *, n_percentiles=10, min_pct=5, max_pct=95,
    matmul_dtype=jnp.bfloat16,
):
    """x: [batch, num_tiles, input_dim] -> [batch]  (same semantics as the torch module).

    matmul_dtype: MXU operand dtype for the fc1 contraction (accumulation is always f32).
    bfloat16 (default) hits the native MXU path on v5e/v6e/v7x; pass jnp.float32 for
    strict numerical parity with the torch reference.
    """
    b, n, d = x.shape
    P = n_percentiles
    H = w1.shape[-1]

    # ---- static percentile plan (trace time, numpy) ------------------------
    fracs = np.linspace(min_pct / 100.0, max_pct / 100.0, P)
    plan = []
    for frac in fracs:
        idx_float = frac * (n - 1)
        il = int(np.floor(idx_float))
        iu = int(np.ceil(idx_float))
        plan.append((il, iu, float(idx_float - il)))
    unique_ranks = tuple(sorted({r for il, iu, _ in plan for r in (il, iu)}))
    r_pos = {r: s for s, r in enumerate(unique_ranks)}
    R = len(unique_ranks)

    # Fold percentile interpolation + the torch.cat() feature order (feature = dim*P + p,
    # i.e. d-major) into fc1:  agg @ w1 == concat_r(sel[r]) @ W_eff   (W_eff: [R*d, H]).
    C = np.zeros((R, P), np.float32)
    for p, (il, iu, wgt) in enumerate(plan):
        C[r_pos[il], p] += 1.0 - wgt
        C[r_pos[iu], p] += wgt
    w1_pmajor = jnp.transpose(jnp.reshape(w1.astype(jnp.float32), (d, P, H)), (1, 0, 2))
    w_eff = jnp.einsum("rp,pdh->rdh", jnp.asarray(C), w1_pmajor,
                       precision=jax.lax.Precision.HIGHEST)        # exact fold
    w_eff = jnp.reshape(w_eff, (R * d, H)).astype(matmul_dtype)

    b1_r = jnp.reshape(b1, (1, H)).astype(jnp.float32)
    w2_r = jnp.reshape(w2, (1, H)).astype(jnp.float32)             # fc2 weight as a row
    b2_r = jnp.reshape(b2, (1, 1)).astype(jnp.float32)

    # ---- batch blocking / VMEM budgeting ------------------------------------
    VMEM_LIMIT = 32 * 1024 * 1024       # explicit scoped-VMEM limit (ok on v5e/v6e/v7x)
    SIZING_BUDGET = 24 * 1024 * 1024    # headroom for pipeline buffers / compiler scratch
    B_blk = _pick_batch_block(b, n, d, R, H, x.dtype.itemsize, SIZING_BUDGET)
    num_steps = pl.cdiv(b, B_blk)

    # NOTE: when b is not a multiple of B_blk the last input block reads unspecified
    # padding rows; the corresponding output entries are sliced off below, so this is
    # benign (rows are fully independent inside the kernel).
    # TODO(synk): for input_dim < 128, pack 128//d batch rows into the lane dimension for
    # the O(n^2) rank phase (full lane occupancy) and unpack before the dot.
    # TODO(synk): for very large num_tiles*input_dim, add a feature-dim grid axis so the
    # per-step block still fits the VMEM budget.
    out = pl.pallas_call(
        functools.partial(_fused_kernel, n=n, unique_ranks=unique_ranks),
        out_shape=jax.ShapeDtypeStruct((num_steps, B_blk), x.dtype),
        grid=(num_steps,),
        in_specs=[
            pl.BlockSpec((B_blk, n, d), lambda i: (i, 0, 0)),
            # Weights/biases resident across the batch grid (constant index_map).
            pl.BlockSpec((R * d, H), lambda i: (0, 0)),
            pl.BlockSpec((1, H), lambda i: (0, 0)),
            pl.BlockSpec((1, H), lambda i: (0, 0)),
            pl.BlockSpec((1, 1), lambda i: (0, 0)),
        ],
        out_specs=pl.BlockSpec((1, B_blk), lambda i: (i, 0)),       # lane-dense output row
        compiler_params=pltpu.CompilerParams(
            dimension_semantics=("parallel",),
            vmem_limit_bytes=VMEM_LIMIT,
        ),
    )(x, w_eff, b1_r, w2_r, b2_r)

    return jnp.reshape(out, (num_steps * B_blk,))[:b]


# ----------------------------------------------------------------------------
# Pure-JAX reference (mirrors the PyTorch forward) for correctness check
# ----------------------------------------------------------------------------
def _reference(x, w1, b1, w2, b2, n_percentiles=10, min_pct=5, max_pct=95):
    b, n, d = x.shape
    fracs = np.linspace(min_pct / 100.0, max_pct / 100.0, n_percentiles)
    xs = jnp.sort(jnp.transpose(x, (0, 2, 1)), axis=2)  # [b, d, n]
    cols = []
    for frac in fracs:
        idx_float = frac * (n - 1)
        il = int(np.floor(idx_float))
        iu = int(np.ceil(idx_float))
        w = idx_float - il
        cols.append(xs[:, :, il] * (1.0 - w) + xs[:, :, iu] * w)  # [b, d]
    # d-major flatten (feature = dim*P + p) == torch.cat([per-dim [b,P] blocks], dim=1)
    agg = jnp.stack(cols, axis=2).reshape(b, d * n_percentiles)
    h = jnp.maximum(agg @ w1 + b1, 0.0)
    return (h @ w2 + b2)[:, 0]


if __name__ == "__main__":
    # Small shapes consistent with the module's forward:
    batch, num_tiles, input_dim = 2, 8, 32
    n_percentiles, mlp_hidden = 10, 32
    feat = input_dim * n_percentiles

    key = jax.random.PRNGKey(0)
    k1, k2, k3, k4, k5 = jax.random.split(key, 5)
    x = jax.random.normal(k1, (batch, num_tiles, input_dim), jnp.float32)
    # nn.Linear-shaped synthetic params: fc1 [feat->hidden] (rows in d-major order), fc2 [hidden->1].
    w1 = jax.random.normal(k2, (feat, mlp_hidden), jnp.float32) / np.sqrt(feat)
    b1 = jax.random.normal(k3, (1, mlp_hidden), jnp.float32) * 0.01
    w2 = jax.random.normal(k4, (mlp_hidden, 1), jnp.float32) / np.sqrt(mlp_hidden)
    b2 = jax.random.normal(k5, (1, 1), jnp.float32) * 0.01

    ref = _reference(x, w1, b1, w2, b2, n_percentiles=n_percentiles)

    # Perf-default path: bf16 MXU operands with f32 accumulation.
    out_bf16 = jax.block_until_ready(
        percentile_model_forward(x, w1, b1, w2, b2, n_percentiles=n_percentiles)
    )
    np.testing.assert_allclose(np.asarray(out_bf16), np.asarray(ref), rtol=2e-2, atol=2e-2)

    # Strict-parity path: f32 MXU operands.
    out_f32 = jax.block_until_ready(
        percentile_model_forward(
            x, w1, b1, w2, b2, n_percentiles=n_percentiles, matmul_dtype=jnp.float32
        )
    )
    np.testing.assert_allclose(np.asarray(out_f32), np.asarray(ref), rtol=1e-4, atol=1e-4)

    print("KERNEL_OK")
</pallas_src>

<mosaic_0001>
module attributes {stable_mosaic.version = 11 : i64} {
  func.func @_fused_kernel(%arg0: i32, %arg1: memref<2x8x32xf32, #tpu.memory_space<vmem>>, %arg2: memref<256x32xbf16, #tpu.memory_space<vmem>>, %arg3: memref<1x32xf32, #tpu.memory_space<vmem>>, %arg4: memref<1x32xf32, #tpu.memory_space<vmem>>, %arg5: memref<1x1xf32, #tpu.memory_space<vmem>>, %arg6: memref<1x2xf32, #tpu.memory_space<vmem>>) attributes {dimension_semantics = [#tpu.dimension_semantics<parallel>], iteration_bounds = array<i64: 1>, scalar_prefetch = 0 : i64, scratch_operands = 0 : i64, tpu.core_type = #tpu.core_type<tc>, window_params = [{transform_indices = @transform_0, window_bounds = array<i64: 2, 8, 32>}, {pipeline_mode = #tpu.pipeline_mode<synchronous>, transform_indices = @transform_1, window_bounds = array<i64: 256, 32>}, {pipeline_mode = #tpu.pipeline_mode<synchronous>, transform_indices = @transform_2, window_bounds = array<i64: 1, 32>}, {pipeline_mode = #tpu.pipeline_mode<synchronous>, transform_indices = @transform_3, window_bounds = array<i64: 1, 32>}, {pipeline_mode = #tpu.pipeline_mode<synchronous>, transform_indices = @transform_4, window_bounds = array<i64: 1, 1>}, {transform_indices = @transform_5, window_bounds = array<i64: 1, 2>}]} {
    %c0 = arith.constant 0 : index
    %c0_0 = arith.constant 0 : index
    %c0_1 = arith.constant 0 : index
    %0 = vector.load %arg1[%c0, %c0_0, %c0_1] : memref<2x8x32xf32, #tpu.memory_space<vmem>>, vector<2x8x32xf32>
    %1 = tpu.iota {dimensions = array<i32: 1>} : vector<1x8x32xi32>
    %c0_i32 = arith.constant 0 : i32
    %2 = vector.broadcast %c0_i32 : i32 to vector<2x8x32xi32>
    %3 = vector.extract_strided_slice %0 {offsets = [0, 0, 0], sizes = [2, 1, 32], strides = [1, 1, 1]} : vector<2x8x32xf32> to vector<2x1x32xf32>
    %4 = vector.broadcast %3 : vector<2x1x32xf32> to vector<2x8x32xf32>
    %5 = arith.cmpf olt, %4, %0 : vector<2x8x32xf32>
    %6 = vector.broadcast %3 : vector<2x1x32xf32> to vector<2x8x32xf32>
    %7 = arith.cmpf oeq, %6, %0 : vector<2x8x32xf32>
    %c0_i32_2 = arith.constant 0 : i32
    %8 = vector.broadcast %c0_i32_2 : i32 to vector<1x8x32xi32>
    %9 = arith.cmpi sgt, %1, %8 : vector<1x8x32xi32>
    %10 = vector.broadcast %9 : vector<1x8x32xi1> to vector<2x8x32xi1>
    %11 = arith.andi %7, %10 : vector<2x8x32xi1>
    %12 = arith.ori %5, %11 : vector<2x8x32xi1>
    %13 = arith.extui %12 : vector<2x8x32xi1> to vector<2x8x32xi32>
    %14 = arith.addi %2, %13 : vector<2x8x32xi32>
    %15 = vector.extract_strided_slice %0 {offsets = [0, 1, 0], sizes = [2, 1, 32], strides = [1, 1, 1]} : vector<2x8x32xf32> to vector<2x1x32xf32>
    %16 = vector.broadcast %15 : vector<2x1x32xf32> to vector<2x8x32xf32>
    %17 = arith.cmpf olt, %16, %0 : vector<2x8x32xf32>
    %18 = vector.broadcast %15 : vector<2x1x32xf32> to vector<2x8x32xf32>
    %19 = arith.cmpf oeq, %18, %0 : vector<2x8x32xf32>
    %c1_i32 = arith.constant 1 : i32
    %20 = vector.broadcast %c1_i32 : i32 to vector<1x8x32xi32>
    %21 = arith.cmpi sgt, %1, %20 : vector<1x8x32xi32>
    %22 = vector.broadcast %21 : vector<1x8x32xi1> to vector<2x8x32xi1>
    %23 = arith.andi %19, %22 : vector<2x8x32xi1>
    %24 = arith.ori %17, %23 : vector<2x8x32xi1>
    %25 = arith.extui %24 : vector<2x8x32xi1> to vector<2x8x32xi32>
    %26 = arith.addi %14, %25 : vector<2x8x32xi32>
    %27 = vector.extract_strided_slice %0 {offsets = [0, 2, 0], sizes = [2, 1, 32], strides = [1, 1, 1]} : vector<2x8x32xf32> to vector<2x1x32xf32>
    %28 = vector.broadcast %27 : vector<2x1x32xf32> to vector<2x8x32xf32>
    %29 = arith.cmpf olt, %28, %0 : vector<2x8x32xf32>
    %30 = vector.broadcast %27 : vector<2x1x32xf32> to vector<2x8x32xf32>
    %31 = arith.cmpf oeq, %30, %0 : vector<2x8x32xf32>
    %c2_i32 = arith.constant 2 : i32
    %32 = vector.broadcast %c2_i32 : i32 to vector<1x8x32xi32>
    %33 = arith.cmpi sgt, %1, %32 : vector<1x8x32xi32>
    %34 = vector.broadcast %33 : vector<1x8x32xi1> to vector<2x8x32xi1>
    %35 = arith.andi %31, %34 : vector<2x8x32xi1>
    %36 = arith.ori %29, %35 : vector<2x8x32xi1>
    %37 = arith.extui %36 : vector<2x8x32xi1> to vector<2x8x32xi32>
    %38 = arith.addi %26, %37 : vector<2x8x32xi32>
    %39 = vector.extract_strided_slice %0 {offsets = [0, 3, 0], sizes = [2, 1, 32], strides = [1, 1, 1]} : vector<2x8x32xf32> to vector<2x1x32xf32>
    %40 = vector.broadcast %39 : vector<2x1x32xf32> to vector<2x8x32xf32>
    %41 = arith.cmpf olt, %40, %0 : vector<2x8x32xf32>
    %42 = vector.broadcast %39 : vector<2x1x32xf32> to vector<2x8x32xf32>
    %43 = arith.cmpf oeq, %42, %0 : vector<2x8x32xf32>
    %c3_i32 = arith.constant 3 : i32
    %44 = vector.broadcast %c3_i32 : i32 to vector<1x8x32xi32>
    %45 = arith.cmpi sgt, %1, %44 : vector<1x8x32xi32>
    %46 = vector.broadcast %45 : vector<1x8x32xi1> to vector<2x8x32xi1>
    %47 = arith.andi %43, %46 : vector<2x8x32xi1>
    %48 = arith.ori %41, %47 : vector<2x8x32xi1>
    %49 = arith.extui %48 : vector<2x8x32xi1> to vector<2x8x32xi32>
    %50 = arith.addi %38, %49 : vector<2x8x32xi32>
    %51 = vector.extract_strided_slice %0 {offsets = [0, 4, 0], sizes = [2, 1, 32], strides = [1, 1, 1]} : vector<2x8x32xf32> to vector<2x1x32xf32>
    %52 = vector.broadcast %51 : vector<2x1x32xf32> to vector<2x8x32xf32>
    %53 = arith.cmpf olt, %52, %0 : vector<2x8x32xf32>
    %54 = vector.broadcast %51 : vector<2x1x32xf32> to vector<2x8x32xf32>
    %55 = arith.cmpf oeq, %54, %0 : vector<2x8x32xf32>
    %c4_i32 = arith.constant 4 : i32
    %56 = vector.broadcast %c4_i32 : i32 to vector<1x8x32xi32>
    %57 = arith.cmpi sgt, %1, %56 : vector<1x8x32xi32>
    %58 = vector.broadcast %57 : vector<1x8x32xi1> to vector<2x8x32xi1>
    %59 = arith.andi %55, %58 : vector<2x8x32xi1>
    %60 = arith.ori %53, %59 : vector<2x8x32xi1>
    %61 = arith.extui %60 : vector<2x8x32xi1> to vector<2x8x32xi32>
    %62 = arith.addi %50, %61 : vector<2x8x32xi32>
    %63 = vector.extract_strided_slice %0 {offsets = [0, 5, 0], sizes = [2, 1, 32], strides = [1, 1, 1]} : vector<2x8x32xf32> to vector<2x1x32xf32>
    %64 = vector.broadcast %63 : vector<2x1x32xf32> to vector<2x8x32xf32>
    %65 = arith.cmpf olt, %64, %0 : vector<2x8x32xf32>
    %66 = vector.broadcast %63 : vector<2x1x32xf32> to vector<2x8x32xf32>
    %67 = arith.cmpf oeq, %66, %0 : vector<2x8x32xf32>
    %c5_i32 = arith.constant 5 : i32
    %68 = vector.broadcast %c5_i32 : i32 to vector<1x8x32xi32>
    %69 = arith.cmpi sgt, %1, %68 : vector<1x8x32xi32>
    %70 = vector.broadcast %69 : vector<1x8x32xi1> to vector<2x8x32xi1>
    %71 = arith.andi %67, %70 : vector<2x8x32xi1>
    %72 = arith.ori %65, %71 : vector<2x8x32xi1>
    %73 = arith.extui %72 : vector<2x8x32xi1> to vector<2x8x32xi32>
    %74 = arith.addi %62, %73 : vector<2x8x32xi32>
    %75 = vector.extract_strided_slice %0 {offsets = [0, 6, 0], sizes = [2, 1, 32], strides = [1, 1, 1]} : vector<2x8x32xf32> to vector<2x1x32xf32>
    %76 = vector.broadcast %75 : vector<2x1x32xf32> to vector<2x8x32xf32>
    %77 = arith.cmpf olt, %76, %0 : vector<2x8x32xf32>
    %78 = vector.broadcast %75 : vector<2x1x32xf32> to vector<2x8x32xf32>
    %79 = arith.cmpf oeq, %78, %0 : vector<2x8x32xf32>
    %c6_i32 = arith.constant 6 : i32
    %80 = vector.broadcast %c6_i32 : i32 to vector<1x8x32xi32>
    %81 = arith.cmpi sgt, %1, %80 : vector<1x8x32xi32>
    %82 = vector.broadcast %81 : vector<1x8x32xi1> to vector<2x8x32xi1>
    %83 = arith.andi %79, %82 : vector<2x8x32xi1>
    %84 = arith.ori %77, %83 : vector<2x8x32xi1>
    %85 = arith.extui %84 : vector<2x8x32xi1> to vector<2x8x32xi32>
    %86 = arith.addi %74, %85 : vector<2x8x32xi32>
    %87 = vector.extract_strided_slice %0 {offsets = [0, 7, 0], sizes = [2, 1, 32], strides = [1, 1, 1]} : vector<2x8x32xf32> to vector<2x1x32xf32>
    %88 = vector.broadcast %87 : vector<2x1x32xf32> to vector<2x8x32xf32>
    %89 = arith.cmpf olt, %88, %0 : vector<2x8x32xf32>
    %90 = vector.broadcast %87 : vector<2x1x32xf32> to vector<2x8x32xf32>
    %91 = arith.cmpf oeq, %90, %0 : vector<2x8x32xf32>
    %c7_i32 = arith.constant 7 : i32
    %92 = vector.broadcast %c7_i32 : i32 to vector<1x8x32xi32>
    %93 = arith.cmpi sgt, %1, %92 : vector<1x8x32xi32>
    %94 = vector.broadcast %93 : vector<1x8x32xi1> to vector<2x8x32xi1>
    %95 = arith.andi %91, %94 : vector<2x8x32xi1>
    %96 = arith.ori %89, %95 : vector<2x8x32xi1>
    %97 = arith.extui %96 : vector<2x8x32xi1> to vector<2x8x32xi32>
    %98 = arith.addi %86, %97 : vector<2x8x32xi32>
    %c0_i32_3 = arith.constant 0 : i32
    %99 = vector.broadcast %c0_i32_3 : i32 to vector<2x8x32xi32>
    %100 = arith.cmpi eq, %98, %99 : vector<2x8x32xi32>
    %cst = arith.constant 0.000000e+00 : f32
    %101 = vector.broadcast %cst : f32 to vector<2x8x32xf32>
    %102 = arith.select %100, %0, %101 : vector<2x8x32xi1>, vector<2x8x32xf32>
    %cst_4 = arith.constant dense<0.000000e+00> : vector<2x32xf32>
    %103 = vector.multi_reduction <add>, %102, %cst_4 [1] : vector<2x8x32xf32> to vector<2x32xf32>
    %c1_i32_5 = arith.constant 1 : i32
    %104 = vector.broadcast %c1_i32_5 : i32 to vector<2x8x32xi32>
    %105 = arith.cmpi eq, %98, %104 : vector<2x8x32xi32>
    %cst_6 = arith.constant 0.000000e+00 : f32
    %106 = vector.broadcast %cst_6 : f32 to vector<2x8x32xf32>
    %107 = arith.select %105, %0, %106 : vector<2x8x32xi1>, vector<2x8x32xf32>
    %cst_7 = arith.constant dense<0.000000e+00> : vector<2x32xf32>
    %108 = vector.multi_reduction <add>, %107, %cst_7 [1] : vector<2x8x32xf32> to vector<2x32xf32>
    %c2_i32_8 = arith.constant 2 : i32
    %109 = vector.broadcast %c2_i32_8 : i32 to vector<2x8x32xi32>
    %110 = arith.cmpi eq, %98, %109 : vector<2x8x32xi32>
    %cst_9 = arith.constant 0.000000e+00 : f32
    %111 = vector.broadcast %cst_9 : f32 to vector<2x8x32xf32>
    %112 = arith.select %110, %0, %111 : vector<2x8x32xi1>, vector<2x8x32xf32>
    %cst_10 = arith.constant dense<0.000000e+00> : vector<2x32xf32>
    %113 = vector.multi_reduction <add>, %112, %cst_10 [1] : vector<2x8x32xf32> to vector<2x32xf32>
    %c3_i32_11 = arith.constant 3 : i32
    %114 = vector.broadcast %c3_i32_11 : i32 to vector<2x8x32xi32>
    %115 = arith.cmpi eq, %98, %114 : vector<2x8x32xi32>
    %cst_12 = arith.constant 0.000000e+00 : f32
    %116 = vector.broadcast %cst_12 : f32 to vector<2x8x32xf32>
    %117 = arith.select %115, %0, %116 : vector<2x8x32xi1>, vector<2x8x32xf32>
    %cst_13 = arith.constant dense<0.000000e+00> : vector<2x32xf32>
    %118 = vector.multi_reduction <add>, %117, %cst_13 [1] : vector<2x8x32xf32> to vector<2x32xf32>
    %c4_i32_14 = arith.constant 4 : i32
    %119 = vector.broadcast %c4_i32_14 : i32 to vector<2x8x32xi32>
    %120 = arith.cmpi eq, %98, %119 : vector<2x8x32xi32>
    %cst_15 = arith.constant 0.000000e+00 : f32
    %121 = vector.broadcast %cst_15 : f32 to vector<2x8x32xf32>
    %122 = arith.select %120, %0, %121 : vector<2x8x32xi1>, vector<2x8x32xf32>
    %cst_16 = arith.constant dense<0.000000e+00> : vector<2x32xf32>
    %123 = vector.multi_reduction <add>, %122, %cst_16 [1] : vector<2x8x32xf32> to vector<2x32xf32>
    %c5_i32_17 = arith.constant 5 : i32
    %124 = vector.broadcast %c5_i32_17 : i32 to vector<2x8x32xi32>
    %125 = arith.cmpi eq, %98, %124 : vector<2x8x32xi32>
    %cst_18 = arith.constant 0.000000e+00 : f32
    %126 = vector.broadcast %cst_18 : f32 to vector<2x8x32xf32>
    %127 = arith.select %125, %0, %126 : vector<2x8x32xi1>, vector<2x8x32xf32>
    %cst_19 = arith.constant dense<0.000000e+00> : vector<2x32xf32>
    %128 = vector.multi_reduction <add>, %127, %cst_19 [1] : vector<2x8x32xf32> to vector<2x32xf32>
    %c6_i32_20 = arith.constant 6 : i32
    %129 = vector.broadcast %c6_i32_20 : i32 to vector<2x8x32xi32>
    %130 = arith.cmpi eq, %98, %129 : vector<2x8x32xi32>
    %cst_21 = arith.constant 0.000000e+00 : f32
    %131 = vector.broadcast %cst_21 : f32 to vector<2x8x32xf32>
    %132 = arith.select %130, %0, %131 : vector<2x8x32xi1>, vector<2x8x32xf32>
    %cst_22 = arith.constant dense<0.000000e+00> : vector<2x32xf32>
    %133 = vector.multi_reduction <add>, %132, %cst_22 [1] : vector<2x8x32xf32> to vector<2x32xf32>
    %c7_i32_23 = arith.constant 7 : i32
    %134 = vector.broadcast %c7_i32_23 : i32 to vector<2x8x32xi32>
    %135 = arith.cmpi eq, %98, %134 : vector<2x8x32xi32>
    %cst_24 = arith.constant 0.000000e+00 : f32
    %136 = vector.broadcast %cst_24 : f32 to vector<2x8x32xf32>
    %137 = arith.select %135, %0, %136 : vector<2x8x32xi1>, vector<2x8x32xf32>
    %cst_25 = arith.constant dense<0.000000e+00> : vector<2x32xf32>
    %138 = vector.multi_reduction <add>, %137, %cst_25 [1] : vector<2x8x32xf32> to vector<2x32xf32>
    %139 = tpu.concatenate %103, %108, %113, %118, %123, %128, %133, %138 in 1 : vector<2x32xf32>, vector<2x32xf32>, vector<2x32xf32>, vector<2x32xf32>, vector<2x32xf32>, vector<2x32xf32>, vector<2x32xf32>, vector<2x32xf32> -> vector<2x256xf32>
    %140 = arith.truncf %139 : vector<2x256xf32> to vector<2x256xbf16>
    %c0_26 = arith.constant 0 : index
    %c0_27 = arith.constant 0 : index
    %141 = vector.load %arg2[%c0_26, %c0_27] : memref<256x32xbf16, #tpu.memory_space<vmem>>, vector<256x32xbf16>
    %cst_28 = arith.constant dense<0.000000e+00> : vector<2x32xf32>
    %142 = tpu.matmul %140, %141, %cst_28 {dimension_numbers = #tpu.dot_dimension_numbers<[1], [0], [0], [1], [0, 0, 1, 1], [], []>} : vector<2x256xbf16>, vector<256x32xbf16>, vector<2x32xf32> -> vector<2x32xf32>
    %c0_29 = arith.constant 0 : index
    %c0_30 = arith.constant 0 : index
    %143 = vector.load %arg3[%c0_29, %c0_30] : memref<1x32xf32, #tpu.memory_space<vmem>>, vector<1x32xf32>
    %144 = vector.broadcast %143 : vector<1x32xf32> to vector<2x32xf32>
    %145 = arith.addf %142, %144 : vector<2x32xf32>
    %cst_31 = arith.constant 0.000000e+00 : f32
    %146 = vector.broadcast %cst_31 : f32 to vector<2x32xf32>
    %147 = arith.maximumf %145, %146 : vector<2x32xf32>
    %c0_32 = arith.constant 0 : index
    %c0_33 = arith.constant 0 : index
    %148 = vector.load %arg4[%c0_32, %c0_33] : memref<1x32xf32, #tpu.memory_space<vmem>>, vector<1x32xf32>
    %149 = vector.broadcast %148 : vector<1x32xf32> to vector<2x32xf32>
    %150 = arith.mulf %147, %149 : vector<2x32xf32>
    %cst_34 = arith.constant dense<0.000000e+00> : vector<2xf32>
    %151 = vector.multi_reduction <add>, %150, %cst_34 [1] : vector<2x32xf32> to vector<2xf32>
    %152 = vector.shape_cast %151 : vector<2xf32> to vector<1x2xf32>
    %c0_35 = arith.constant 0 : index
    %c0_36 = arith.constant 0 : index
    %153 = vector.load %arg5[%c0_35, %c0_36] : memref<1x1xf32, #tpu.memory_space<vmem>>, vector<1x1xf32>
    %154 = vector.broadcast %153 : vector<1x1xf32> to vector<1x2xf32>
    %155 = arith.addf %152, %154 : vector<1x2xf32>
    %c0_37 = arith.constant 0 : index
    %c0_38 = arith.constant 0 : index
    %156 = vector.load %arg6[%c0_37, %c0_38] : memref<1x2xf32, #tpu.memory_space<vmem>>, vector<1x2xf32>
    tpu.vector_store %arg6[%c0_37, %c0_38], %155 {strides = array<i32>} : memref<1x2xf32, #tpu.memory_space<vmem>>, vector<1x2xf32>,
    return
  }
  func.func @transform_0(%arg0: i32) -> (i32, i32, i32) {
    %c0_i32 = arith.constant 0 : i32
    %c0_i32_0 = arith.constant 0 : i32
    %c0_i32_1 = arith.constant 0 : i32
    return %arg0, %c0_i32, %c0_i32_0 : i32, i32, i32
  }
  func.func @transform_1(%arg0: i32) -> (i32, i32) {
    %c0_i32 = arith.constant 0 : i32
    %c0_i32_0 = arith.constant 0 : i32
    %c0_i32_1 = arith.constant 0 : i32
    return %c0_i32, %c0_i32_0 : i32, i32
  }
  func.func @transform_2(%arg0: i32) -> (i32, i32) {
    %c0_i32 = arith.constant 0 : i32
    %c0_i32_0 = arith.constant 0 : i32
    %c0_i32_1 = arith.constant 0 : i32
    return %c0_i32, %c0_i32_0 : i32, i32
  }
  func.func @transform_3(%arg0: i32) -> (i32, i32) {
    %c0_i32 = arith.constant 0 : i32
    %c0_i32_0 = arith.constant 0 : i32
    %c0_i32_1 = arith.constant 0 : i32
    return %c0_i32, %c0_i32_0 : i32, i32
  }
  func.func @transform_4(%arg0: i32) -> (i32, i32) {
    %c0_i32 = arith.constant 0 : i32
    %c0_i32_0 = arith.constant 0 : i32
    %c0_i32_1 = arith.constant 0 : i32
    return %c0_i32, %c0_i32_0 : i32, i32
  }
  func.func @transform_5(%arg0: i32) -> (i32, i32) {
    %c0_i32 = arith.constant 0 : i32
    %c0_i32_0 = arith.constant 0 : i32
    return %arg0, %c0_i32 : i32, i32
  }
}

</mosaic_0001>

<bundles_post_ra>
// kernel: tpu_custom_call.1
= control target key start
LH: loop header
LB: loop body
LE: loop exit
PB: predicated region body
PF: predicated region fallthrough
CT: control target
= control target key end

     0   :  { %s1026_s0 = inlined_call_operand.vmem [shape: f32[2,8,32], index: 0, kind: input, shape index: {}]   ;;  %s1027_s1 = inlined_call_operand.vmem [shape: bf16[256,32], index: 1, kind: input, shape index: {}]   ;;  %s1028_s2 = inlined_call_operand.vmem [shape: f32[1,32], index: 2, kind: input, shape index: {}]   ;;  %s1029_s3 = inlined_call_operand.vmem [shape: f32[1,32], index: 3, kind: input, shape index: {}]   ;;  %s1030_s4 = inlined_call_operand.<no memory space> [shape: f32[1,1], index: 4, kind: input, shape index: {}]   ;;  %s1031_s5 = inlined_call_operand.hbm [shape: f32[1,2], index: 5, kind: output, shape index: {}]  }
   0x1   :  { %v10_v0 = vstv %s1030_s4 }
   0x2   :  { %11 = vst [vmem:[#allocation2] sm:$0x1] %v10_v0 }
   0x3   :  { %v26_v1 = vlaneseq  ;;  %v775_v2 = vld [vmem:[%s1026_s0] sm:$0xff]  ;;  %v780_v3 = vld [vmem:[%s1026_s0 + $0x8] sm:$0xff]  ;;  %v734_v4 = vmov 0   ;;  %v698_v17 = vld [vmem:[%s1027_s1 + $0x50] sm:$0xff]  }
   0x4   :  { %693 = vset.pattern.permute.xlu0 %v734_v4  ;;  %v694_v6 = vld [vmem:[%s1027_s1 + $0x40] sm:$0xff]   ;;  %v696_v10 = vld [vmem:[%s1027_s1 + $0x48] sm:$0xff]   ;;  %v699_v18 = vld [vmem:[%s1027_s1 + $0x10] sm:$0xff]  }
   0x5   :  { %v784_v5 = vshrl.u32 %v26_v1, 7  ;;  %v695_v7 = vld [vmem:[%s1027_s1] sm:$0xff]   ;;  %651 = vmatprep.subr.bf16.mxu0 %v694_v6  ;;  %v697_v12 = vld [vmem:[%s1027_s1 + $0x8] sm:$0xff]   ;;  %v700_v21 = vld [vmem:[%s1027_s1 + $0x58] sm:$0xff]  }
   0x6   :  { %652 = vmatpush3.bf16.msra.mxu0 %v695_v7  ;;  %v701_v23 = vld [vmem:[%s1027_s1 + $0x18] sm:$0xff]   ;;  %v702_v24 = vld [vmem:[%s1027_s1 + $0x60] sm:$0xff]   ;;  %v704_v32 = vld [vmem:[%s1027_s1 + $0x68] sm:$0xff]  }
   0x7   :  { %v793_v8 = vsub.s32 0, %v784_v5  ;;  %v51_v9 = vsub.s32 1, %v784_v5  ;;  %vm40_vm0 = vcmp.gt.s32.totalorder %v784_v5, 0  ;;  %v74_v11 = vsub.s32 2, %v784_v5  ;;  %653 = vmatprep.subr.bf16.mxu0 %v696_v10  ;;  %v703_v30 = vld [vmem:[%s1027_s1 + $0x20] sm:$0xff]  }
   0x8   :  { %vm61_vm8 = vcmp.gt.s32.totalorder %v784_v5, 1  ;;  %v97_v20 = vsub.s32 3, %v784_v5  ;;  %vm84_vm15 = vcmp.gt.s32.totalorder %v784_v5, 2  ;;  %v120_v27 = vsub.s32 4, %v784_v5 }
   0x9   :  { %v31_v13 = vrot.slane %v775_v2, %v793_v8  ;;  %v35_v14 = vrot.slane %v780_v3, %v793_v8  ;;  %v52_v15 = vrot.slane %v775_v2, %v51_v9  ;;  %v56_v16 = vrot.slane %v780_v3, %v51_v9 }
   0xa   :  { %654 = vmatpush3.bf16.msra.mxu0 %v697_v12  ;;  %v75_v19 = vrot.slane %v775_v2, %v74_v11  ;;  %v79_v22 = vrot.slane %v780_v3, %v74_v11  ;;  %v98_v26 = vrot.slane %v775_v2, %v97_v20  ;;  %v102_v29 = vrot.slane %v780_v3, %v97_v20 }
   0xb   :  { %vm36_vm1 = vcmp.lt.f32.partialorder %v31_v13, %v775_v2  ;;  %vm38_vm2 = vcmp.eq.f32.partialorder %v31_v13, %v775_v2  ;;  %vm39_vm3 = vcmp.eq.f32.partialorder %v35_v14, %v780_v3  ;;  %vm37_vm4 = vcmp.lt.f32.partialorder %v35_v14, %v780_v3  ;;  %655 = vmatprep.subr.bf16.mxu0 %v698_v17 }
   0xc   :  { %vm43_vm5 = vmand %vm38_vm2, %vm40_vm0  ;;  %vm59_vm7 = vcmp.eq.f32.partialorder %v52_v15, %v775_v2  ;;  %vm60_vm10 = vcmp.eq.f32.partialorder %v56_v16, %v780_v3  ;;  %vm57_vm12 = vcmp.lt.f32.partialorder %v52_v15, %v775_v2  ;;  %vm58_vm13 = vcmp.lt.f32.partialorder %v56_v16, %v780_v3 }
   0xd   :  { %vm44_vm6 = vmand %vm39_vm3, %vm40_vm0  ;;  %vm83_vm3 = vcmp.eq.f32.partialorder %v79_v22, %v780_v3  ;;  %v121_v36 = vrot.slane %v775_v2, %v120_v27  ;;  %v143_v37 = vsub.s32 5, %v784_v5  ;;  %v125_v38 = vrot.slane %v780_v3, %v120_v27 }
   0xe   :  { %vm45_vm9 = vmor %vm36_vm1, %vm43_vm5  ;;  %656 = vmatpush3.bf16.msra.mxu0 %v699_v18  ;;  %vm82_vm1 = vcmp.eq.f32.partialorder %v75_v19, %v775_v2  ;;  %vm80_vm5 = vcmp.lt.f32.partialorder %v75_v19, %v775_v2  ;;  %v166_v44 = vsub.s32 6, %v784_v5  ;;  %v189_v49 = vsub.s32 7, %v784_v5 }
   0xf   :  { %vm46_vm11 = vmor %vm37_vm4, %vm44_vm6  ;;  %v47_v25 = vsel %vm45_vm9, 1, %v734_v4  ;;  %657 = vmatprep.subr.bf16.mxu0 %v700_v21  ;;  %vm81_vm6 = vcmp.lt.f32.partialorder %v79_v22, %v780_v3  ;;  %v144_v43 = vrot.slane %v775_v2, %v143_v37  ;;  %v148_v45 = vrot.slane %v780_v3, %v143_v37 }
  0x10   :  { %vm64_vm14 = vmand %vm59_vm7, %vm61_vm8  ;;  %v48_v28 = vsel %vm46_vm11, 1, %v734_v4  ;;  %v167_v51 = vrot.slane %v775_v2, %v166_v44  ;;  %v171_v52 = vrot.slane %v780_v3, %v166_v44  ;;  %v190_v56 = vrot.slane %v775_v2, %v189_v49 }
  0x11   :  { %vm65_vm0 = vmand %vm60_vm10, %vm61_vm8  ;;  %vm107_vm8 = vcmp.gt.s32.totalorder %v784_v5, 3  ;;  %vm105_vm10 = vcmp.eq.f32.partialorder %v98_v26, %v775_v2  ;;  %v194_v58 = vrot.slane %v780_v3, %v189_v49 }
  0x12   :  { %vm66_vm2 = vmor %vm57_vm12, %vm64_vm14  ;;  %658 = vmatpush3.bf16.msra.mxu0 %v701_v23  ;;  %vm106_vm12 = vcmp.eq.f32.partialorder %v102_v29, %v780_v3  ;;  %vm103_vm14 = vcmp.lt.f32.partialorder %v98_v26, %v775_v2 }
  0x13   :  { %vm67_vm4 = vmor %vm58_vm13, %vm65_vm0  ;;  %v68_v31 = vsel %vm66_vm2, 1, %v734_v4  ;;  %659 = vmatprep.subr.bf16.mxu0 %v702_v24 }
  0x14   :  { %v69_v33 = vsel %vm67_vm4, 1, %v734_v4  ;;  %v70_v34 = vadd.s32 %v68_v31, %v47_v25  ;;  %vm87_vm7 = vmand %vm82_vm1, %vm84_vm15  ;;  %vm130_vm1 = vcmp.gt.s32.totalorder %v784_v5, 4 }
  0x15   :  { %v71_v35 = vadd.s32 %v69_v33, %v48_v28  ;;  %vm88_vm9 = vmand %vm83_vm3, %vm84_vm15  ;;  %vm104_vm15 = vcmp.lt.f32.partialorder %v102_v29, %v780_v3  ;;  %vm128_vm3 = vcmp.eq.f32.partialorder %v121_v36, %v775_v2 }
  0x16   :  { %vm89_vm11 = vmor %vm80_vm5, %vm87_vm7  ;;  %660 = vmatpush3.bf16.msra.mxu0 %v703_v30  ;;  %vm129_vm5 = vcmp.eq.f32.partialorder %v125_v38, %v780_v3  ;;  %vm126_vm7 = vcmp.lt.f32.partialorder %v121_v36, %v775_v2 }
  0x17   :  { %vm90_vm13 = vmor %vm81_vm6, %vm88_vm9  ;;  %v91_v39 = vsel %vm89_vm11, 1, %v734_v4  ;;  %661 = vmatprep.subr.bf16.mxu0 %v704_v32  ;;  %vm151_vm11 = vcmp.eq.f32.partialorder %v144_v43, %v775_v2 }
  0x18   :  { %v92_v40 = vsel %vm90_vm13, 1, %v734_v4  ;;  %v93_v41 = vadd.s32 %v91_v39, %v70_v34  ;;  %vm110_vm0 = vmand %vm105_vm10, %vm107_vm8 }
  0x19   :  { %v94_v42 = vadd.s32 %v92_v40, %v71_v35  ;;  %vm111_vm2 = vmand %vm106_vm12, %vm107_vm8  ;;  %vm127_vm8 = vcmp.lt.f32.partialorder %v125_v38, %v780_v3  ;;  %vm153_vm12 = vcmp.gt.s32.totalorder %v784_v5, 5 }
  0x1a   :  { %vm112_vm4 = vmor %vm103_vm14, %vm110_vm0  ;;  %vm152_vm14 = vcmp.eq.f32.partialorder %v148_v45, %v780_v3  ;;  %vm149_vm0 = vcmp.lt.f32.partialorder %v144_v43, %v775_v2 }
  0x1b   :  { %vm113_vm6 = vmor %vm104_vm15, %vm111_vm2  ;;  %v114_v46 = vsel %vm112_vm4, 1, %v734_v4  ;;  %vm174_vm4 = vcmp.eq.f32.partialorder %v167_v51, %v775_v2 }
  0x1c   :  { %v115_v47 = vsel %vm113_vm6, 1, %v734_v4  ;;  %v116_v48 = vadd.s32 %v114_v46, %v93_v41  ;;  %vm133_vm9 = vmand %vm128_vm3, %vm130_vm1 }
  0x1d   :  { %v117_v50 = vadd.s32 %v115_v47, %v94_v42  ;;  %vm134_vm10 = vmand %vm129_vm5, %vm130_vm1  ;;  %vm150_vm1 = vcmp.lt.f32.partialorder %v148_v45, %v780_v3  ;;  %vm176_vm5 = vcmp.gt.s32.totalorder %v784_v5, 6 }
  0x1e   :  { %vm135_vm13 = vmor %vm126_vm7, %vm133_vm9  ;;  %vm175_vm7 = vcmp.eq.f32.partialorder %v171_v52, %v780_v3  ;;  %vm172_vm9 = vcmp.lt.f32.partialorder %v167_v51, %v775_v2 }
  0x1f   :  { %vm136_vm15 = vmor %vm127_vm8, %vm134_vm10  ;;  %v137_v53 = vsel %vm135_vm13, 1, %v734_v4  ;;  %vm173_vm10 = vcmp.lt.f32.partialorder %v171_v52, %v780_v3 }
  0x20   :  { %v138_v54 = vsel %vm136_vm15, 1, %v734_v4  ;;  %v139_v55 = vadd.s32 %v137_v53, %v116_v48  ;;  %vm156_vm2 = vmand %vm151_vm11, %vm153_vm12 }
  0x21   :  { %v140_v57 = vadd.s32 %v138_v54, %v117_v50  ;;  %vm157_vm3 = vmand %vm152_vm14, %vm153_vm12  ;;  %vm195_vm12 = vcmp.lt.f32.partialorder %v190_v56, %v775_v2  ;;  %vm196_vm14 = vcmp.lt.f32.partialorder %v194_v58, %v780_v3 }
  0x22   :  { %vm158_vm6 = vmor %vm149_vm0, %vm156_vm2  ;;  %v206_v0 = vsel %vm195_vm12, 1, %v734_v4  ;;  %v207_v9 = vsel %vm196_vm14, 1, %v734_v4 }
  0x23   :  { %vm159_vm8 = vmor %vm150_vm1, %vm157_vm3  ;;  %v160_v59 = vsel %vm158_vm6, 1, %v734_v4 }
  0x24   :  { %v161_v60 = vsel %vm159_vm8, 1, %v734_v4  ;;  %v162_v61 = vadd.s32 %v160_v59, %v139_v55  ;;  %vm179_vm11 = vmand %vm174_vm4, %vm176_vm5 }
  0x25   :  { %v163_v62 = vadd.s32 %v161_v60, %v140_v57  ;;  %vm180_vm13 = vmand %vm175_vm7, %vm176_vm5 }
  0x26   :  { %vm181_vm15 = vmor %vm172_vm9, %vm179_vm11 }
  0x27   :  { %vm182_vm0 = vmor %vm173_vm10, %vm180_vm13  ;;  %v183_v63 = vsel %vm181_vm15, 1, %v734_v4 }
  0x28   :  { %v184_v6 = vsel %vm182_vm0, 1, %v734_v4  ;;  %v185_v7 = vadd.s32 %v183_v63, %v162_v61 }
  0x29   :  { %12 = vsyncpa [#allocation4], 0  ;;  %v186_v10 = vadd.s32 %v184_v6, %v163_v62  ;;  %vm214_vm1 = vcmask 261120   ;;  %vm357_vm9 = vcmask 1041409   ;;  %v705_v40 = vld [vmem:[%s1027_s1 + $0x28] sm:$0xff]   ;;  %v706_v41 = vld [vmem:[%s1027_s1 + $0x70] sm:$0xff]  }
  0x2a   :  { %v924_v11 = vadd.s32 %v206_v0, %v185_v7  ;;  %662 = vmatpush3.bf16.msra.mxu0 %v705_v40  ;;  %s735_s4 = smov 32   ;;  %s736_s28 = smov 64  }
  0x2b   :  { %v926_v12 = vadd.s32 %v207_v9, %v186_v10  ;;  %663 = vmatprep.subr.bf16.mxu0 %v706_v41 }
  0x2c   :  { %vm229_vm2 = vcmp.eq.s32.totalorder %v924_v11, 1  ;;  %vm301_vm3 = vcmp.eq.s32.totalorder %v924_v11, 5  ;;  %vm247_vm4 = vcmp.eq.s32.totalorder %v924_v11, 2  ;;  %vm319_vm5 = vcmp.eq.s32.totalorder %v924_v11, 6 }
  0x2d   :  { %vm230_vm6 = vcmp.eq.s32.totalorder %v926_v12, 1  ;;  %v231_v13 = vsel %vm229_vm2, %v775_v2, 0.0  ;;  %vm302_vm7 = vcmp.eq.s32.totalorder %v926_v12, 5  ;;  %v303_v4 = vsel %vm301_vm3, %v775_v2, 0.0 }
  0x2e   :  { %v232_v14 = vsel %vm230_vm6, %v780_v3, 0.0  ;;  %v233_v15 = vsel %vm214_vm1, %v231_v13, 0.0  ;;  %v304_v16 = vsel %vm302_vm7, %v780_v3, 0.0  ;;  %v305_v17 = vsel %vm214_vm1, %v303_v4, 0.0 }
  0x2f   :  { %v234_v18 = vrot.slane %v233_v15, 4  ;;  %v240_v19 = vsel %vm214_vm1, %v232_v14, 0.0  ;;  %v306_v20 = vrot.slane %v305_v17, 4  ;;  %v312_v21 = vsel %vm214_vm1, %v304_v16, 0.0 }
  0x30   :  { %v241_v22 = vrot.slane %v240_v19, 4  ;;  %v313_v23 = vrot.slane %v312_v21, 4  ;;  %vm248_vm8 = vcmp.eq.s32.totalorder %v926_v12, 2  ;;  %v249_v24 = vsel %vm247_vm4, %v775_v2, 0.0 }
  0x31   :  { %v235_v25 = vadd.f32 %v234_v18, %v233_v15  ;;  %v307_v26 = vadd.f32 %v306_v20, %v305_v17  ;;  %v250_v27 = vsel %vm248_vm8, %v780_v3, 0.0  ;;  %v251_v28 = vsel %vm214_vm1, %v249_v24, 0.0  ;;  %v707_v15 = vld [vmem:[%s1027_s1 + $0x30] sm:$0xff]  }
  0x32   :  { %v242_v29 = vadd.f32 %v241_v22, %v240_v19  ;;  %v314_v30 = vadd.f32 %v313_v23, %v312_v21  ;;  %v252_v31 = vrot.slane %v251_v28, 4  ;;  %v258_v32 = vsel %vm214_vm1, %v250_v27, 0.0  ;;  %664 = vmatpush3.bf16.msra.mxu0 %v707_v15 }
  0x33   :  { %v236_v33 = vrot.slane %v235_v25, 2  ;;  %v308_v34 = vrot.slane %v307_v26, 2  ;;  %v259_v35 = vrot.slane %v258_v32, 4  ;;  %vm320_vm10 = vcmp.eq.s32.totalorder %v926_v12, 6 }
  0x34   :  { %v243_v36 = vrot.slane %v242_v29, 2  ;;  %v315_v37 = vrot.slane %v314_v30, 2  ;;  %v253_v38 = vadd.f32 %v252_v31, %v251_v28  ;;  %v321_v39 = vsel %vm319_vm5, %v775_v2, 0.0 }
  0x35   :  { %v237_v42 = vadd.f32 %v236_v33, %v235_v25  ;;  %v309_v43 = vadd.f32 %v308_v34, %v307_v26  ;;  %v260_v44 = vadd.f32 %v259_v35, %v258_v32  ;;  %v322_v45 = vsel %vm320_vm10, %v780_v3, 0.0 }
  0x36   :  { %v244_v46 = vadd.f32 %v243_v36, %v242_v29  ;;  %v316_v47 = vadd.f32 %v315_v37, %v314_v30  ;;  %v254_v48 = vrot.slane %v253_v38, 2  ;;  %v323_v49 = vsel %vm214_vm1, %v321_v39, 0.0 }
  0x37   :  { %v238_v50 = vrot.slane %v237_v42, 1  ;;  %v310_v51 = vrot.slane %v309_v43, 1  ;;  %v261_v52 = vrot.slane %v260_v44, 2  ;;  %v324_v53 = vrot.slane %v323_v49, 4 }
  0x38   :  { %v245_v54 = vrot.slane %v244_v46, 1  ;;  %v317_v55 = vrot.slane %v316_v47, 1  ;;  %v255_v56 = vadd.f32 %v254_v48, %v253_v38  ;;  %v330_v57 = vsel %vm214_vm1, %v322_v45, 0.0  ;;  %v708_v48 = vld [vmem:[%s1027_s1 + $0x78] sm:$0xff]  }
  0x39   :  { %v239_v58 = vadd.f32 %v238_v50, %v237_v42  ;;  %v311_v59 = vadd.f32 %v310_v51, %v309_v43  ;;  %v262_v60 = vadd.f32 %v261_v52, %v260_v44  ;;  %v325_v61 = vadd.f32 %v324_v53, %v323_v49  ;;  %v709_v49 = vld [vmem:[%s1027_s1 + $0x38] sm:$0xff]   ;;  %665 = vmatprep.subr.bf16.mxu0 %v708_v48  ;;  %s737_s1 = smov 96  }
  0x3a   :  { %v246_v62 = vadd.f32 %v245_v54, %v244_v46  ;;  %v318_v63 = vadd.f32 %v317_v55, %v316_v47  ;;  %v256_v0 = vrot.slane %v255_v56, 1  ;;  %v331_v6 = vrot.slane %v330_v57, 4  ;;  %666 = vmatpush3.bf16.msra.mxu0 %v709_v49 }
  0x3b   :  { %v263_v7 = vrot.slane %v262_v60, 1  ;;  %v326_v9 = vrot.slane %v325_v61, 2  ;;  %vm265_vm11 = vcmp.eq.s32.totalorder %v924_v11, 3  ;;  %vm266_vm12 = vcmp.eq.s32.totalorder %v926_v12, 3 }
  0x3c   :  { %v362_v10 = vsel %vm357_vm9, %v246_v62, %v239_v58  ;;  %v384_v13 = vsel %vm357_vm9, %v318_v63, %v311_v59  ;;  %v257_v4 = vadd.f32 %v256_v0, %v255_v56  ;;  %v332_v14 = vadd.f32 %v331_v6, %v330_v57 }
  0x3d   :  { %v678_v16 = vpack.i.bf16 %v362_v10, %v384_v13  ;;  %v264_v17 = vadd.f32 %v263_v7, %v262_v60  ;;  %v327_v18 = vadd.f32 %v326_v9, %v325_v61  ;;  %v267_v19 = vsel %vm265_vm11, %v775_v2, 0.0 }
  0x3e   :  { %v333_v20 = vrot.slane %v332_v14, 2  ;;  %v268_v21 = vsel %vm266_vm12, %v780_v3, 0.0  ;;  %v269_v22 = vsel %vm214_vm1, %v267_v19, 0.0  ;;  %vm337_vm13 = vcmp.eq.s32.totalorder %v924_v11, 7 }
  0x3f   :  { %679 = vrot.lane.b32.xlu0 %v678_v16, %s735_s4  ;;  %v328_v23 = vrot.slane %v327_v18, 1  ;;  %v368_v24 = vsel %vm357_vm9, %v264_v17, %v257_v4  ;;  %v270_v25 = vrot.slane %v269_v22, 4  ;;  %v276_v26 = vsel %vm214_vm1, %v268_v21, 0.0 }
  0x40   :  { %v334_v27 = vadd.f32 %v333_v20, %v332_v14  ;;  %v277_v28 = vrot.slane %v276_v26, 4  ;;  %vm338_vm14 = vcmp.eq.s32.totalorder %v926_v12, 7  ;;  %v339_v29 = vsel %vm337_vm13, %v775_v2, 0.0 }
  0x41   :  { %v329_v30 = vadd.f32 %v328_v23, %v327_v18  ;;  %v271_v31 = vadd.f32 %v270_v25, %v269_v22  ;;  %v340_v32 = vsel %vm338_vm14, %v780_v3, 0.0  ;;  %v341_v33 = vsel %vm214_vm1, %v339_v29, 0.0 }
  0x42   :  { %v335_v34 = vrot.slane %v334_v27, 1  ;;  %v278_v35 = vadd.f32 %v277_v28, %v276_v26  ;;  %v342_v36 = vrot.slane %v341_v33, 4  ;;  %v348_v37 = vsel %vm214_vm1, %v340_v32, 0.0 }
  0x43   :  { %v272_v38 = vrot.slane %v271_v31, 2  ;;  %v349_v39 = vrot.slane %v348_v37, 4  ;;  %vm211_vm15 = vcmp.eq.s32.totalorder %v926_v12, 0  ;;  %vm210_vm0 = vcmp.eq.s32.totalorder %v924_v11, 0 }
  0x44   :  { %v336_v40 = vadd.f32 %v335_v34, %v334_v27  ;;  %v279_v41 = vrot.slane %v278_v35, 2  ;;  %v343_v42 = vadd.f32 %v342_v36, %v341_v33  ;;  %v213_v43 = vsel %vm211_vm15, %v780_v3, 0.0 }
  0x45   :  { %v273_v44 = vadd.f32 %v272_v38, %v271_v31  ;;  %v350_v45 = vadd.f32 %v349_v39, %v348_v37  ;;  %v222_v46 = vsel %vm214_vm1, %v213_v43, 0.0  ;;  %v212_v47 = vsel %vm210_vm0, %v775_v2, 0.0 }
  0x46   :  { %v390_v50 = vsel %vm357_vm9, %v336_v40, %v329_v30  ;;  %v280_v51 = vadd.f32 %v279_v41, %v278_v35  ;;  %v344_v52 = vrot.slane %v343_v42, 2  ;;  %v223_v53 = vrot.slane %v222_v46, 4 }
  0x47   :  { %v683_v54 = vpack.i.bf16 %v368_v24, %v390_v50  ;;  %v274_v55 = vrot.slane %v273_v44, 1  ;;  %v351_v56 = vrot.slane %v350_v45, 2  ;;  %v215_v57 = vsel %vm214_vm1, %v212_v47, 0.0 }
  0x48   :  { %v281_v58 = vrot.slane %v280_v51, 1  ;;  %v345_v59 = vadd.f32 %v344_v52, %v343_v42  ;;  %v224_v60 = vadd.f32 %v223_v53, %v222_v46  ;;  %v216_v61 = vrot.slane %v215_v57, 4 }
  0x49   :  { %684 = vrot.lane.b32.xlu0 %v683_v54, %s736_s28  ;;  %v275_v62 = vadd.f32 %v274_v55, %v273_v44  ;;  %v352_v63 = vadd.f32 %v351_v56, %v350_v45  ;;  %vm283_vm2 = vcmp.eq.s32.totalorder %v924_v11, 4  ;;  %vm284_vm3 = vcmp.eq.s32.totalorder %v926_v12, 4  ;;  %v598_v55 = vld [vmem:[#allocation2] sm:$0x1] }
  0x4a   :  { %v282_v0 = vadd.f32 %v281_v58, %v280_v51  ;;  %v346_v6 = vrot.slane %v345_v59, 1  ;;  %v225_v7 = vrot.slane %v224_v60, 2  ;;  %v217_v9 = vadd.f32 %v216_v61, %v215_v57  ;;  %v633_v57 = vld [vmem:[%s1028_s2] ss:$0 sm:$0xff]  ;;  %s738_s2 = smov [#allocation3]  }
  0x4b   :  { %v353_v10 = vrot.slane %v352_v63, 1  ;;  %v285_v13 = vsel %vm283_vm2, %v775_v2, 0.0  ;;  %v286_v4 = vsel %vm284_vm3, %v780_v3, 0.0  ;;  %vm401_vm4 = vcmask 523264   ;;  %s625_s8 = sshll.u32 %s738_s2, 4  ;;  %s626_s8 = int_to_ptr.vmem [resolvable:$true] %s625_s8 }
  0x4c   :  { %v347_v14 = vadd.f32 %v346_v6, %v345_v59  ;;  %v226_v15 = vadd.f32 %v225_v7, %v224_v60  ;;  %v218_v16 = vrot.slane %v217_v9, 2  ;;  %v374_v18 = vsel %vm357_vm9, %v282_v0, %v275_v62  ;;  %s714_s9 = scalar_lea.vmem %s626_s8, 32  ;;  %p715_p1 = scmp.lt.s32.totalorder %s626_s8, %s626_s8 }
  0x4d   :  { %v354_v17 = vadd.f32 %v353_v10, %v352_v63  ;;  %v287_v19 = vsel %vm214_vm1, %v285_v13, 0.0  ;;  %v294_v11 = vsel %vm214_vm1, %v286_v4, 0.0  ;;  %vm403_vm5 = vcmask 785408   ;;  %601 = vperm.xlu0 %693, %v598_v55   ;;  %v650_v63 = vld [vmem:[%s1029_s3] ss:$0 sm:$0xff]  ;;  %s710_s3 = scalar_lea.vmem %s626_s8, 16 }
  0x4e   :  { %v227_v12 = vrot.slane %v226_v15, 1  ;;  %v219_v20 = vadd.f32 %v218_v16, %v217_v9  ;;  %v288_v21 = vrot.slane %v287_v19, 4  ;;  %v295_v22 = vrot.slane %v294_v11, 4  ;;  %p711_p0 = scmp.ne.s32.totalorder %s626_s8, %s710_s3  ;;  %p716_p2 = scmp.lt.s32.totalorder %s714_s9, %s710_s3 }
  0x4f   :  { %v396_v23 = vsel %vm357_vm9, %v354_v17, %v347_v14  ;;  %v611_v10 = vand.u32 127, %v26_v1  ;;  %vm617_vm6 = vcmask 8192  }
  0x50   :  { %v688_v24 = vpack.i.bf16 %v374_v18, %v396_v23  ;;  %v228_v2 = vadd.f32 %v227_v12, %v226_v15  ;;  %v220_v25 = vrot.slane %v219_v20, 1  ;;  %v289_v3 = vadd.f32 %v288_v21, %v287_v19  ;;  %p717_p3 = por %p716_p2, %p715_p1 }
  0x51   :  { %v296_v26 = vadd.f32 %v295_v22, %v294_v11  ;;  %v614_v4 = vsub.s32 %v611_v10, %v784_v5 }
  0x52   :  { %689 = vrot.lane.b32.xlu1 %v688_v24, %s737_s1  ;;  %v221_v27 = vadd.f32 %v220_v25, %v219_v20  ;;  %v290_v28 = vrot.slane %v289_v3, 2  ;;  %p718_p4 = pnand %p717_p3, %p711_p0 }
  0x53   :  { %v297_v29 = vrot.slane %v296_v26, 2 }
  0x54   :  { %v358_v30 = vsel %vm357_vm9, %v228_v2, %v221_v27  ;;  %v291_v31 = vadd.f32 %v290_v28, %v289_v3 }
  0x55   :  { %v298_v32 = vadd.f32 %v297_v29, %v296_v26 }
  0x56   :  { %v292_v33 = vrot.slane %v291_v31, 1 }
  0x57   :  { %v299_v34 = vrot.slane %v298_v32, 1 }
  0x58   :  { %v293_v35 = vadd.f32 %v292_v33, %v291_v31 }
  0x59   :  { %v300_v36 = vadd.f32 %v299_v34, %v298_v32 }
  0x5b   :  { %v380_v37 = vsel %vm357_vm9, %v300_v36, %v293_v35 }
  0xb1   :  { %v680_v38 = vpop.permute.xlu0 %679 }
  0xb2   :  { %v682_v40 = vunpack.i.h.bf16 %v680_v38  ;;  %v681_v41 = vunpack.i.l.bf16 %v680_v38 }
  0xb4   :  { %v400_v44 = vsel %vm214_vm1, %v358_v30, %v682_v40  ;;  %v405_v45 = vsel %vm214_vm1, %v380_v37, %v681_v41  ;;  %vm594_vm1 = vcmask 254976  }
  0xbb   :  { %v685_v39 = vpop.permute.xlu0 %684 }
  0xbc   :  { %v687_v42 = vunpack.i.h.bf16 %v685_v39  ;;  %v686_v43 = vunpack.i.l.bf16 %v685_v39 }
  0xbe   :  { %v406_v47 = vsel %vm401_vm4, %v405_v45, %v686_v43  ;;  %v402_v48 = vsel %vm401_vm4, %v400_v44, %v687_v42 }
  0xc4   :  { %v690_v46 = vpop.permute.xlu1 %689 }
  0xc5   :  { %v692_v49 = vunpack.i.h.bf16 %v690_v46  ;;  %v691_v50 = vunpack.i.l.bf16 %v690_v46 }
  0xc7   :  { %v407_v51 = vsel %vm403_vm5, %v406_v47, %v691_v50  ;;  %v404_v52 = vsel %vm403_vm5, %v402_v48, %v692_v49 }
  0xc8   :  { %v409_v53 = vpack.c.bf16 %v407_v51, %v407_v51  ;;  %v408_v54 = vpack.c.bf16 %v404_v52, %v404_v52 }
  0xca   :  { %577 = vmatprep.mubr.bf16.mxu0 %v409_v53 }
  0xcb   :  { %578 = vmatmul.mubr.bf16.vlgmr.msra.gmra.mrb[0].mxu0 %v408_v54 }
  0xcc   :  { %v602_v9 = vpop.permute.xlu0 %601 }
  0xcd   :  { %v607_v13 = vrot.slane %v602_v9, %v793_v8 }
 0x19e   :  { %v667_v56 = vpop.f32.mrb[0].mxu0 }
 0x19f   :  { %v668_v58 = vpop.f32.mrb[1].mxu0 }
 0x1a0   :  { %v669_v59 = vadd.f32 %v668_v58, %v667_v56  ;;  %v670_v60 = vpop.f32.mrb[2].mxu0 }
 0x1a1   :  { %v671_v61 = vpop.f32.mrb[3].mxu0 }
 0x1a2   :  { %v580_v62 = vadd.f32 %v669_v59, %v633_v57 }
 0x1a4   :  { %v585_v0 = vmax.f32 %v580_v62, 0.0 }
 0x1a6   :  { %v593_v6 = vmul.f32 %v650_v63, %v585_v0 }
 0x1a8   :  { %v595_v7 = vsel %vm594_vm1, %v593_v6, 0.0 }
 0x1a9   :  { %596 = vadd.xlane.f32.xlu1 %v595_v7 }
 0x236   :  { %v597_v14 = vpop.xlane.xlu1 %596 }
 0x237   :  { %v608_v15 = vadd.f32 %v607_v13, %v597_v14 }
 0x239   :  { %v615_v16 = vrot.slane %v608_v15, %v614_v4 }
 0x23b   :  { %618 = vst.msk [vmem:[#allocation3] sm:$0x1] %vm617_vm6, %v615_v16 }
 0x23c   :  { %721 = shalt.err (!%p718_p4)
}
 0x23d   :  { %s722_s12 = scalar_lea.hbm %s1031_s5, 16 }
 0x23e   :  { %p723_p5 = scmp.ne.s32.totalorder %s1031_s5, %s722_s12  ;;  %p726_p6 = scmp.lt.u32.totalorder %s722_s12, %s1031_s5 }
 0x240   :  { %p728_p7 = pnand %p726_p6, %p723_p5 }
 0x242   :  { %731 = shalt.err (!%p728_p7)
}
 0x243   :  { %628 = dma.vmem_to_hbm [thread:$0]  %s626_s8, 16, %s1031_s5, [#allocation4]  }
 0x244   :  { %732 = dma.done.wait [#allocation4], 16  }
 0x245   :  { %733 = vsyncadd [#allocation4], 4294967280 }
 0x246   :  { %632 = vsyncpa [#allocation4], 1 }

</bundles_post_ra>
